<compile_context>
chip_gen: v7x
topology: tpu7x:2x2x1
jax: 0.10.0
libtpu: 0.0.40
codegen_flags: <defaults>
</compile_context>

<pallas_src>
import functools

import jax
import jax.numpy as jnp
from jax.experimental import pallas as pl
from jax.experimental.pallas import tpu as pltpu


def _round_up(x, m):
    return ((x + m - 1) // m) * m


def _qnet_kernel(xa_ref, w1_ref, b1_ref, w2_ref, b2_ref, w3_ref, b3_ref, out_ref):
    # fc1: [bb,12] @ [12,400] -- bf16 MXU, f32 accumulate; bias + ReLU in f32 on the VPU.
    h1 = jnp.dot(xa_ref[...].astype(jnp.bfloat16), w1_ref[...],
                 preferred_element_type=jnp.float32)
    h1 = jnp.maximum(h1 + b1_ref[...], 0.0).astype(jnp.bfloat16)   # explicit bf16 staging

    # fc2: [bb,400] @ [400,300] -- bf16 MXU, f32 accumulate.
    h2 = jnp.dot(h1, w2_ref[...], preferred_element_type=jnp.float32)
    h2 = jnp.maximum(h2 + b2_ref[...], 0.0)

    # fc3: 1-wide output would waste the MXU -> VPU multiply + lane reduction instead.
    q = jnp.sum(h2 * w3_ref[...], axis=-1, keepdims=True) + b3_ref[...]
    # TODO(synk): for large training batches, emit a lane-dense [1, bb] output block
    # (avoids masked vst on the skinny column) and transpose back in the wrapper.
    out_ref[...] = q.astype(out_ref.dtype)


def prepare_params(params_list):
    """Stack + pre-cast N critics' params ONCE, outside the per-step forward.

    params_list: list of (w1[in,400], b1[1,400], w2[400,300], b2[1,300], w3[300,1], b3[1,1]),
    all float32. Returns the kernel-ready (stacked, bf16 matmul weights) pytree.
    """
    w1 = jnp.stack([p[0] for p in params_list]).astype(jnp.bfloat16)                # [N,in,400]
    b1 = jnp.stack([p[1] for p in params_list]).astype(jnp.float32)                 # [N,1,400]
    w2 = jnp.stack([p[2] for p in params_list]).astype(jnp.bfloat16)                # [N,400,300]
    b2 = jnp.stack([p[3] for p in params_list]).astype(jnp.float32)                 # [N,1,300]
    w3 = jnp.stack([p[4].reshape(1, -1) for p in params_list]).astype(jnp.float32)  # [N,1,300]
    b3 = jnp.stack([p[5].reshape(1, 1) for p in params_list]).astype(jnp.float32)   # [N,1,1]
    return (w1, b1, w2, b2, w3, b3)


@functools.partial(jax.jit, static_argnames=("block_b",))
def soft_q_forward_stacked(x, a, prepared, *, block_b=512):
    """x: [B,obs], a: [B,act], prepared: N stacked critics -> q: [N,B,1] float32."""
    w1, b1, w2, b2, w3, b3 = prepared
    n_nets, in_dim, h1_dim = w1.shape
    h2_dim = w2.shape[2]
    B = x.shape[0]
    assert x.shape[1] + a.shape[1] == in_dim

    # Fused torch.cat([x, a], 1): tiny [B, in_dim] tensor built in the wrapper.
    xa = jnp.concatenate([x.astype(jnp.float32), a.astype(jnp.float32)], axis=1)

    # Balanced batch blocks (padding waste < 16 rows, never a whole block).
    nb = max(1, -(-B // block_b))
    bb = min(_round_up(block_b, 16), _round_up(-(-B // nb), 16))
    b_pad = nb * bb
    if b_pad != B:
        xa = jnp.pad(xa, ((0, b_pad - B), (0, 0)))

    grid = (n_nets, nb)

    def resident3(shape):
        # Constant index along the batch axis -> stays resident in VMEM across batch blocks;
        # re-DMA'd only when the network index changes.
        return pl.BlockSpec((None,) + shape, lambda n, i: (n, 0, 0))

    flops = 2 * n_nets * b_pad * (in_dim * h1_dim + h1_dim * h2_dim + h2_dim)
    bytes_accessed = (
        2 * (w1.size + w2.size)                       # bf16 matmul weights
        + 4 * (b1.size + b2.size + w3.size + b3.size)
        + 4 * b_pad * in_dim                          # activations in
        + 4 * n_nets * b_pad                          # q out
    )

    q = pl.pallas_call(
        _qnet_kernel,
        out_shape=jax.ShapeDtypeStruct((n_nets, b_pad, 1), jnp.float32),
        grid=grid,
        in_specs=[
            pl.BlockSpec((bb, in_dim), lambda n, i: (i, 0)),   # xa block (shared by all nets)
            resident3((in_dim, h1_dim)),                       # W1 (bf16)
            resident3((1, h1_dim)),                            # b1
            resident3((h1_dim, h2_dim)),                       # W2 (bf16)
            resident3((1, h2_dim)),                            # b2
            resident3((1, h2_dim)),                            # w3 as a row (f32, VPU head)
            resident3((1, 1)),                                 # b3
        ],
        out_specs=pl.BlockSpec((None, bb, 1), lambda n, i: (n, i, 0)),
        compiler_params=pltpu.CompilerParams(
            dimension_semantics=("parallel", "parallel")),     # v7x: nets/blocks across 2 TCs
        cost_estimate=pl.CostEstimate(flops=int(flops), transcendentals=0,
                                      bytes_accessed=int(bytes_accessed)),
    )(xa, w1, b1, w2, b2, w3, b3)

    return q[:, :B, :]


def soft_q_forward(x, a, prepared, *, block_b=512):
    """Single-critic convenience wrapper (prepared holds exactly one network)."""
    return soft_q_forward_stacked(x, a, prepared, block_b=block_b)[0]


def init_params(key, obs_dim, act_dim, h1=400, h2=300):
    """Deterministic init mirroring nn.Linear default (uniform +/- 1/sqrt(fan_in))."""
    ks = jax.random.split(key, 6)

    def linear(kw, kb, fan_in, fan_out):
        bound = 1.0 / jnp.sqrt(fan_in)
        w = jax.random.uniform(kw, (fan_in, fan_out), jnp.float32, -bound, bound)
        b = jax.random.uniform(kb, (1, fan_out), jnp.float32, -bound, bound)
        return w, b

    w1, b1 = linear(ks[0], ks[1], obs_dim + act_dim, h1)
    w2, b2 = linear(ks[2], ks[3], h1, h2)
    w3, b3 = linear(ks[4], ks[5], h2, 1)
    return (w1, b1, w2, b2, w3, b3)


if __name__ == "__main__":
    # Attitude-dynamics-sized problem: obs_dim=9, act_dim=3, tiny batch.
    batch, obs_dim, act_dim = 2, 9, 3

    key = jax.random.PRNGKey(0)
    k_x, k_a, k_p1, k_p2 = jax.random.split(key, 4)
    x = jax.random.normal(k_x, (batch, obs_dim), jnp.float32)
    a = jax.random.normal(k_a, (batch, act_dim), jnp.float32)

    params_q1 = init_params(k_p1, obs_dim, act_dim)
    params_q2 = init_params(k_p2, obs_dim, act_dim)

    # SAC twin critics: single pallas_call with a leading network grid axis.
    prepared_twin = prepare_params([params_q1, params_q2])
    q_twin = soft_q_forward_stacked(x, a, prepared_twin)
    jax.block_until_ready(q_twin)
    assert q_twin.shape == (2, batch, 1)

    # Single-critic path (original module semantics).
    q1 = soft_q_forward(x, a, prepare_params([params_q1]))
    jax.block_until_ready(q1)
    assert q1.shape == (batch, 1)

    # Pure-JAX reference with the same bf16-matmul / f32-accumulate precision.
    def ref_bf16(params):
        w1, b1, w2, b2, w3, b3 = params
        xa = jnp.concatenate([x, a], axis=1).astype(jnp.bfloat16)
        h = jnp.maximum(jnp.dot(xa, w1.astype(jnp.bfloat16),
                                preferred_element_type=jnp.float32) + b1, 0.0)
        h = jnp.maximum(jnp.dot(h.astype(jnp.bfloat16), w2.astype(jnp.bfloat16),
                                preferred_element_type=jnp.float32) + b2, 0.0)
        return h @ w3 + b3

    # Full-f32 reference (original PyTorch semantics) -- looser tolerance for bf16 weights.
    def ref_f32(params):
        w1, b1, w2, b2, w3, b3 = params
        xa = jnp.concatenate([x, a], axis=1)
        h = jnp.maximum(xa @ w1 + b1, 0.0)
        h = jnp.maximum(h @ w2 + b2, 0.0)
        return h @ w3 + b3

    for n, params in enumerate([params_q1, params_q2]):
        assert jnp.allclose(q_twin[n], ref_bf16(params), atol=1e-2, rtol=1e-2), n
        assert jnp.allclose(q_twin[n], ref_f32(params), atol=1e-1, rtol=1e-1), n
    assert jnp.allclose(q1, q_twin[0], atol=1e-5, rtol=1e-5)

    print("KERNEL_OK")
</pallas_src>

<mosaic_0001>
module attributes {stable_mosaic.version = 11 : i64} {
  func.func @_qnet_kernel(%arg0: i32, %arg1: i32, %arg2: memref<16x12xf32, #tpu.memory_space<vmem>>, %arg3: memref<1x12x400xbf16, #tpu.memory_space<vmem>>, %arg4: memref<1x1x400xf32, #tpu.memory_space<vmem>>, %arg5: memref<1x400x300xbf16, #tpu.memory_space<vmem>>, %arg6: memref<1x1x300xf32, #tpu.memory_space<vmem>>, %arg7: memref<1x1x300xf32, #tpu.memory_space<vmem>>, %arg8: memref<1x1x1xf32, #tpu.memory_space<vmem>>, %arg9: memref<1x16x1xf32, #tpu.memory_space<vmem>>) attributes {dimension_semantics = [#tpu.dimension_semantics<parallel>, #tpu.dimension_semantics<parallel>], iteration_bounds = array<i64: 2, 1>, scalar_prefetch = 0 : i64, scratch_operands = 0 : i64, tpu.core_type = #tpu.core_type<tc>, window_params = [{transform_indices = @transform_0, window_bounds = array<i64: 16, 12>}, {transform_indices = @transform_1, window_bounds = array<i64: 1, 12, 400>}, {transform_indices = @transform_2, window_bounds = array<i64: 1, 1, 400>}, {transform_indices = @transform_3, window_bounds = array<i64: 1, 400, 300>}, {transform_indices = @transform_4, window_bounds = array<i64: 1, 1, 300>}, {transform_indices = @transform_5, window_bounds = array<i64: 1, 1, 300>}, {transform_indices = @transform_6, window_bounds = array<i64: 1, 1, 1>}, {transform_indices = @transform_7, window_bounds = array<i64: 1, 16, 1>}]} {
    %c0 = arith.constant 0 : index
    %c0_0 = arith.constant 0 : index
    %0 = vector.load %arg2[%c0, %c0_0] : memref<16x12xf32, #tpu.memory_space<vmem>>, vector<16x12xf32>
    %1 = arith.truncf %0 : vector<16x12xf32> to vector<16x12xbf16>
    %c0_1 = arith.constant 0 : index
    %c0_2 = arith.constant 0 : index
    %c0_3 = arith.constant 0 : index
    %2 = vector.load %arg3[%c0_1, %c0_2, %c0_3] : memref<1x12x400xbf16, #tpu.memory_space<vmem>>, vector<1x12x400xbf16>
    %3 = vector.shape_cast %2 : vector<1x12x400xbf16> to vector<12x400xbf16>
    %cst = arith.constant dense<0.000000e+00> : vector<16x400xf32>
    %4 = tpu.matmul %1, %3, %cst {dimension_numbers = #tpu.dot_dimension_numbers<[1], [0], [0], [1], [0, 0, 1, 1], [], []>} : vector<16x12xbf16>, vector<12x400xbf16>, vector<16x400xf32> -> vector<16x400xf32>
    %c0_4 = arith.constant 0 : index
    %c0_5 = arith.constant 0 : index
    %c0_6 = arith.constant 0 : index
    %5 = vector.load %arg4[%c0_4, %c0_5, %c0_6] : memref<1x1x400xf32, #tpu.memory_space<vmem>>, vector<1x1x400xf32>
    %6 = vector.shape_cast %5 : vector<1x1x400xf32> to vector<1x400xf32>
    %7 = vector.broadcast %6 : vector<1x400xf32> to vector<16x400xf32>
    %8 = arith.addf %4, %7 : vector<16x400xf32>
    %cst_7 = arith.constant 0.000000e+00 : f32
    %9 = vector.broadcast %cst_7 : f32 to vector<16x400xf32>
    %10 = arith.maximumf %8, %9 : vector<16x400xf32>
    %11 = arith.truncf %10 : vector<16x400xf32> to vector<16x400xbf16>
    %c0_8 = arith.constant 0 : index
    %c0_9 = arith.constant 0 : index
    %c0_10 = arith.constant 0 : index
    %12 = vector.load %arg5[%c0_8, %c0_9, %c0_10] : memref<1x400x300xbf16, #tpu.memory_space<vmem>>, vector<1x400x300xbf16>
    %13 = vector.shape_cast %12 : vector<1x400x300xbf16> to vector<400x300xbf16>
    %cst_11 = arith.constant dense<0.000000e+00> : vector<16x300xf32>
    %14 = tpu.matmul %11, %13, %cst_11 {dimension_numbers = #tpu.dot_dimension_numbers<[1], [0], [0], [1], [0, 0, 1, 1], [], []>} : vector<16x400xbf16>, vector<400x300xbf16>, vector<16x300xf32> -> vector<16x300xf32>
    %c0_12 = arith.constant 0 : index
    %c0_13 = arith.constant 0 : index
    %c0_14 = arith.constant 0 : index
    %15 = vector.load %arg6[%c0_12, %c0_13, %c0_14] : memref<1x1x300xf32, #tpu.memory_space<vmem>>, vector<1x1x300xf32>
    %16 = vector.shape_cast %15 : vector<1x1x300xf32> to vector<1x300xf32>
    %17 = vector.broadcast %16 : vector<1x300xf32> to vector<16x300xf32>
    %18 = arith.addf %14, %17 : vector<16x300xf32>
    %cst_15 = arith.constant 0.000000e+00 : f32
    %19 = vector.broadcast %cst_15 : f32 to vector<16x300xf32>
    %20 = arith.maximumf %18, %19 : vector<16x300xf32>
    %c0_16 = arith.constant 0 : index
    %c0_17 = arith.constant 0 : index
    %c0_18 = arith.constant 0 : index
    %21 = vector.load %arg7[%c0_16, %c0_17, %c0_18] : memref<1x1x300xf32, #tpu.memory_space<vmem>>, vector<1x1x300xf32>
    %22 = vector.shape_cast %21 : vector<1x1x300xf32> to vector<1x300xf32>
    %23 = vector.broadcast %22 : vector<1x300xf32> to vector<16x300xf32>
    %24 = arith.mulf %20, %23 : vector<16x300xf32>
    %cst_19 = arith.constant dense<0.000000e+00> : vector<16xf32>
    %25 = vector.multi_reduction <add>, %24, %cst_19 [1] : vector<16x300xf32> to vector<16xf32>
    %26 = vector.shape_cast %25 : vector<16xf32> to vector<16x1xf32>
    %c0_20 = arith.constant 0 : index
    %c0_21 = arith.constant 0 : index
    %c0_22 = arith.constant 0 : index
    %27 = vector.load %arg8[%c0_20, %c0_21, %c0_22] : memref<1x1x1xf32, #tpu.memory_space<vmem>>, vector<1x1x1xf32>
    %28 = vector.shape_cast %27 : vector<1x1x1xf32> to vector<1x1xf32>
    %29 = vector.broadcast %28 : vector<1x1xf32> to vector<16x1xf32>
    %30 = arith.addf %26, %29 : vector<16x1xf32>
    %c0_23 = arith.constant 0 : index
    %c0_24 = arith.constant 0 : index
    %c0_25 = arith.constant 0 : index
    %31 = vector.load %arg9[%c0_23, %c0_24, %c0_25] : memref<1x16x1xf32, #tpu.memory_space<vmem>>, vector<1x16x1xf32>
    %32 = vector.shape_cast %31 : vector<1x16x1xf32> to vector<16x1xf32>
    %33 = vector.shape_cast %30 : vector<16x1xf32> to vector<1x16x1xf32>
    tpu.vector_store %arg9[%c0_23, %c0_24, %c0_25], %33 {strides = array<i32>} : memref<1x16x1xf32, #tpu.memory_space<vmem>>, vector<1x16x1xf32>,
    return
  }
  func.func @transform_0(%arg0: i32, %arg1: i32) -> (i32, i32) {
    %c0_i32 = arith.constant 0 : i32
    %c0_i32_0 = arith.constant 0 : i32
    return %arg1, %c0_i32 : i32, i32
  }
  func.func @transform_1(%arg0: i32, %arg1: i32) -> (i32, i32, i32) {
    %c0_i32 = arith.constant 0 : i32
    %c0_i32_0 = arith.constant 0 : i32
    %c0_i32_1 = arith.constant 0 : i32
    return %arg0, %c0_i32, %c0_i32_0 : i32, i32, i32
  }
  func.func @transform_2(%arg0: i32, %arg1: i32) -> (i32, i32, i32) {
    %c0_i32 = arith.constant 0 : i32
    %c0_i32_0 = arith.constant 0 : i32
    %c0_i32_1 = arith.constant 0 : i32
    return %arg0, %c0_i32, %c0_i32_0 : i32, i32, i32
  }
  func.func @transform_3(%arg0: i32, %arg1: i32) -> (i32, i32, i32) {
    %c0_i32 = arith.constant 0 : i32
    %c0_i32_0 = arith.constant 0 : i32
    %c0_i32_1 = arith.constant 0 : i32
    return %arg0, %c0_i32, %c0_i32_0 : i32, i32, i32
  }
  func.func @transform_4(%arg0: i32, %arg1: i32) -> (i32, i32, i32) {
    %c0_i32 = arith.constant 0 : i32
    %c0_i32_0 = arith.constant 0 : i32
    %c0_i32_1 = arith.constant 0 : i32
    return %arg0, %c0_i32, %c0_i32_0 : i32, i32, i32
  }
  func.func @transform_5(%arg0: i32, %arg1: i32) -> (i32, i32, i32) {
    %c0_i32 = arith.constant 0 : i32
    %c0_i32_0 = arith.constant 0 : i32
    %c0_i32_1 = arith.constant 0 : i32
    return %arg0, %c0_i32, %c0_i32_0 : i32, i32, i32
  }
  func.func @transform_6(%arg0: i32, %arg1: i32) -> (i32, i32, i32) {
    %c0_i32 = arith.constant 0 : i32
    %c0_i32_0 = arith.constant 0 : i32
    %c0_i32_1 = arith.constant 0 : i32
    return %arg0, %c0_i32, %c0_i32_0 : i32, i32, i32
  }
  func.func @transform_7(%arg0: i32, %arg1: i32) -> (i32, i32, i32) {
    %c0_i32 = arith.constant 0 : i32
    %c0_i32_0 = arith.constant 0 : i32
    return %arg0, %arg1, %c0_i32 : i32, i32, i32
  }
}

</mosaic_0001>

<bundles_post_ra>
// kernel: soft_q_forward_stacked.1
= control target key start
LH: loop header
LB: loop body
LE: loop exit
PB: predicated region body
PF: predicated region fallthrough
CT: control target
= control target key end

     0   :  { %12 = vsyncpa [#allocation3], 0  ;;  %s2172_s0 = inlined_call_operand.vmem [shape: f32[16,12], index: 0, kind: input, shape index: {}]   ;;  %s2173_s1 = inlined_call_operand.vmem [shape: bf16[2,12,400], index: 1, kind: input, shape index: {}]   ;;  %s2174_s2 = inlined_call_operand.vmem [shape: f32[2,1,400], index: 2, kind: input, shape index: {}]   ;;  %s2175_s3 = inlined_call_operand.hbm [shape: bf16[2,400,300], index: 3, kind: input, shape index: {}]   ;;  %s2176_s4 = inlined_call_operand.vmem [shape: f32[2,1,300], index: 4, kind: input, shape index: {}]   ;;  %s2177_s5 = inlined_call_operand.vmem [shape: f32[2,1,300], index: 5, kind: input, shape index: {}]   ;;  %s2178_s6 = inlined_call_operand.vmem [shape: f32[2,1,1], index: 6, kind: input, shape index: {}]   ;;  %s2179_s7 = inlined_call_operand.vmem [shape: f32[2,16,1], index: 7, kind: output, shape index: {}]  }
   0x1   :  { %14 = vsyncpa [#allocation3 + $0x1], 0  ;;  %s1921_s24 = smov 0   ;;  %s1923_s25 = smov 0  }
   0x2   :  { %s1925_s26 = smov 0   ;;  %s1927_s27 = smov 0  }
   0x3   :  { %s1929_s28 = smov 0   ;;  %s1931_s29 = smov 0  }
   0x4 LB: > { %s1495_s30 = sadd.s32 4294967295, %s1875_s29   ;;  %s32_s8 = sadd.s32 1, %s1871_s28  ;;  %s1875_s29 = sphi %s1931_s29, %s20_s29   ;;  %s1871_s28 = sphi %s1929_s28, %s2186_s28   ;;  %s1867_s27 = sphi %s1927_s27, %s2185_s27   ;;  %s1863_s26 = sphi %s1925_s26, %s2184_s26   ;;  %s1859_s25 = sphi %s1923_s25, %s2183_s25   ;;  %s1855_s24 = sphi %s1921_s24, %s2182_s24  }
   0x5   : > { %p34_p0 = scmp.ge.s32.totalorder %s32_s8, 2  ;;  %s117_s9 = sadd.s32 1, %s1863_s26 }
   0x6   : > { %p124_p1 = scmp.ne.s32.totalorder %s1863_s26, %s1859_s25  ;;  %p125_p2 = scmp.eq.s32.totalorder %s1875_s29, 0 }
   0x7   : > { %s2188_s8 = smov (%p34_p0, %s32_s8), 0  ;;  %p130_p4 = scmp.ne.s32.totalorder %s1859_s25, %s1855_s24 }
   0x8   : > { %p126_p3 = por %p125_p2, %p124_p1  ;;  %s114_s10 = ssub.s32 %s1871_s28, %s2188_s8 }
   0x9   : > { %p131_p5 = scmp.eq.s32.totalorder %s1495_s30, 0  ;;  %p115_p6 = scmp.eq.s32.totalorder %s114_s10, 0 }
   0xa   : > { %p1637_p8 = scmp.lt.s32.totalorder %s1875_s29, 2  ;;  %s284_s13 = sand.u32 1, %s1863_s26  }
   0xb   : > { %p1960_p7 = por %p131_p5, %p130_p4  ;;  %s1628_s14 = smul.u32 9600, %s1871_s28 }
   0xc   : > { %s1966_s12 = scalar_select %p115_p6, %s1863_s26, %s117_s9  }
   0xd   : > { %s1627_s15 = smul.u32 600, %s284_s13  ;;  %s1973_s18 = scalar_lea.hbm %s2175_s3, %s1628_s14 }
   0xe   : > { %p1975_p9 = pnand %p1637_p8, %p126_p3  ;;  %s1981_s22 = scalar_lea.sflag [#allocation3], %s284_s13 }
   0xf   : > { %s288_s20 = scalar_lea.vmem [#allocation2], %s1627_s15  ;;  %s1795_s23 = scalar_lea.hbm %s1973_s18, 9600 }
  0x10   : > { %s295_s21 = sshll.u32 %s288_s20, 4  ;;  %p1796_p10 = scmp.ne.s32.totalorder %s1973_s18, %s1795_s23  ;;  %s1979_s21 = int_to_ptr.vmem [resolvable:$true] %s295_s21 }
  0x11   : > { %p1797_p11 = pneg %p1975_p9  ;;  %s1800_s9 = scalar_lea.hbm %s2175_s3, 19200 }
  0x12   : > { %p1801_p0 = scmp.lt.u32.totalorder %s1973_s18, %s2175_s3  ;;  %p1802_p1 = scmp.lt.u32.totalorder %s1800_s9, %s1795_s23 }
  0x13   : > { %p1798_p12 = pnand %p1797_p11, %p1796_p10  ;;  %p1804_p3 = scmp.lt.u32.totalorder %s1795_s23, %s1973_s18 }
  0x14   : > { %p1803_p2 = por %p1802_p1, %p1801_p0 }
  0x15   : > { %p1799_p13 = pneg %p1798_p12 }
  0x16   : > { %p1805_p4 = por %p1804_p3, %p1803_p2 }
  0x18   : > { %p1806_p5 = pnand %p1805_p4, %p1799_p13 }
  0x1a   : > { %1809 = shalt.err (!%p1806_p5)
}
  0x1b   : > { %s1810_s13 = scalar_lea.vmem %s1979_s21, 9600  ;;  %s1877_s15 = smov [#allocation2]  }
  0x1c   : > { %p1811_p6 = scmp.ne.s32.totalorder %s1979_s21, %s1810_s13  ;;  %s1815_s16 = sshll.u32 %s1877_s15, 4  ;;  %s1816_s16 = int_to_ptr.vmem [resolvable:$false] %s1815_s16 }
  0x1d   : > { %s1817_s17 = scalar_lea.vmem %s1816_s16, 19200  ;;  %p1818_p12 = scmp.lt.s32.totalorder %s1979_s21, %s1816_s16 }
  0x1e   : > { %p1813_p8 = pnand %p1811_p6, %p1797_p11  ;;  %p1819_p0 = scmp.lt.s32.totalorder %s1817_s17, %s1810_s13 }
  0x20   : > { %p1814_p10 = pneg %p1813_p8  ;;  %p1820_p1 = por %p1819_p0, %p1818_p12 }
  0x22   : > { %p1821_p2 = pnand %p1820_p1, %p1814_p10 }
  0x24   : > { %1824 = shalt.err (!%p1821_p2)
}
  0x25   : > { %s1878_s20 = smov 192   ;;  %s1879_s23 = smov 12  }
  0x26   : > { %1636 = dma.hbm_to_vmem [thread:$0]  (!%p1975_p9), %s1973_s18, 9600, %s1979_s21, %s1981_s22, %s1878_s20, %s1878_s20, %s1879_s23  }
  0x27   : > { %p1501_p11 = scmp.ge.s32.totalorder %s1875_s29, 1  ;;  %p323_p13 = scmp.lt.s32.totalorder %s1875_s29, 3 }
  0x29   : > { %p324_p3 = pnand %p1501_p11, %p323_p13 }
  0x2a   : > { %s329_s24 = sand.u32 (!%p324_p3), 1, %s1859_s25  }
  0x2b   : > { %327 = sbr.rel (%p324_p3) target bundleno = 691 (0x2b3), region = 48  ;;  %s330_s9 = scalar_lea.sflag (!%p324_p3), [#allocation3], %s329_s24 }
  0x2c   : > { %s1629_s30 = smul.u32 (!%p324_p3), 600, %s329_s24 }
  0x2e   : > { %s2012_s10 = scalar_lea.vmem (!%p324_p3), [#allocation2], %s1629_s30 }
  0x32   : > { %1850 = dma.done.wait (%p1960_p7), %s330_s9, 9600  }
  0x33   : > { %1852 = vsyncadd (%p1960_p7), %s330_s9, 4294957696  ;;  %p399_p4 = scmp.lt.s32.totalorder %s1867_s27, 1  ;;  %v1880_v0 = vmov 0   ;;  %vm479_vm0 = vcmask 1045504   ;;  %v430_v3 = vld [vmem:[%s2172_s0] sm:$0xff]  ;;  %v431_v4 = vld [vmem:[%s2172_s0 + $0x8] sm:$0xff]  ;;  %v439_v59 = vlaneseq }
  0x34   : > { %524 = vmatprep.mubr.bf16.mxu1 %v1880_v0  ;;  %v432_v7 = vpack.c.bf16 %v431_v4, %v430_v3  ;;  %vm475_vm1 = vcmask 97280   ;;  %v1695_v9 = vld [vmem:[%s2012_s10 + $0x4] ss:$12 sps:$4 sm:$0xff]   ;;  %v1697_v10 = vld [vmem:[%s2012_s10] ss:$12 sps:$4 sm:$0xff]   ;;  %vm1107_vm2 = vcmask 130048  }
  0x35   : > { %s2190_s27 = smov (!%p399_p4, %s1867_s27), 1  ;;  %v1698_v12 = vld [vmem:[%s2012_s10 + $0x1c] ss:$12 sps:$4 sm:$0xff]   ;;  %1111 = vmatprep.subr.bf16.mxu0 %v1695_v9  ;;  %v1700_v13 = vld [vmem:[%s2012_s10 + $0x18] ss:$12 sps:$4 sm:$0xff]   ;;  %v440_v60 = vshrl.u32 %v439_v59, 7 }
  0x36   : > { %s1595_s18 = sshll.u32 %s2190_s27, 5  ;;  %1112 = vmatpush1.bf16.msra.mxu0 %v1697_v10  ;;  %v1701_v14 = vld [vmem:[%s2012_s10 + $0x34] ss:$12 sps:$4 sm:$0xff]   ;;  %v1703_v15 = vld [vmem:[%s2012_s10 + $0x30] ss:$12 sps:$4 sm:$0xff]   ;;  %s1504_s16 = sshll.u32 %s2190_s27, 2 }
  0x37   : > { %s403_s22 = scalar_lea.vmem %s2173_s1, %s1595_s18  ;;  %1113 = vmatprep.subr.bf16.mxu0 %v1698_v12  ;;  %v1704_v16 = vld [vmem:[%s2012_s10 + $0x4c] ss:$12 sps:$4 sm:$0xff]   ;;  %v1706_v17 = vld [vmem:[%s2012_s10 + $0x48] ss:$12 sps:$4 sm:$0xff]   ;;  %v1707_v19 = vld [vmem:[%s2012_s10 + $0x64] ss:$12 sps:$4 sm:$0xff]   ;;  %s407_s23 = scalar_lea.vmem %s2174_s2, %s1504_s16 }
  0x38   : > { %v1689_v1 = vld [vmem:[%s403_s22 + $0x4] ss:$16 sps:$4 sm:$0x3f]   ;;  %v1691_v2 = vld [vmem:[%s403_s22] ss:$16 sps:$4 sm:$0x3f]   ;;  %s418_s14 = scalar_lea.vmem %s2178_s6, %s2190_s27 }
  0x39   : > { %1511 = vmatprep.subr.msk.bf16.mxu1 %vm479_vm0, %v1689_v1  ;;  %v1692_v5 = vld [vmem:[%s403_s22 + $0xc] ss:$16 sps:$4 sm:$0x3f]   ;;  %v481_v6 = vsel %vm479_vm0, %v1691_v2, 0  ;;  %v2090_v61 = vsub.s32 0, %v440_v60  ;;  %v2092_v63 = vsub.s32 1, %v440_v60 }
  0x3a   : > { %v1694_v8 = vld [vmem:[%s403_s22 + $0x8] ss:$16 sps:$4 sm:$0x3f]   ;;  %493 = vmatpush1.bf16.msra.mxu1 %v481_v6  ;;  %1114 = vmatpush1.bf16.msra.mxu0 %v1700_v13  ;;  %v437_v62 = vld [vmem:[%s407_s23] sm:$0xf]  ;;  %v2096_v6 = vsub.s32 2, %v440_v60 }
  0x3b   : > { %1513 = vmatprep.subr.msk.bf16.mxu1 %vm479_vm0, %v1692_v5  ;;  %v487_v11 = vsel %vm479_vm0, %v1694_v8, 0  ;;  %1115 = vmatprep.subr.bf16.mxu0 %v1701_v14  ;;  %v1721_v18 = vld [vmem:[%s2012_s10 + $0xc8] ss:$12 sps:$4 sm:$0xff]   ;;  %v1709_v21 = vld [vmem:[%s2012_s10 + $0x60] ss:$12 sps:$4 sm:$0xff]   ;;  %v442_v1 = vrot.slane %v437_v62, %v2090_v61  ;;  %v446_v2 = vrot.slane %v437_v62, %v2092_v63  ;;  %v453_v9 = vsub.s32 3, %v440_v60 }
  0x3c   : > { %v1723_v20 = vld [vmem:[%s2012_s10 + $0x8] ss:$12 sps:$4 sm:$0xff]   ;;  %v1726_v23 = vld [vmem:[%s2012_s10 + $0xe0] ss:$12 sps:$4 sm:$0xff]   ;;  %v1712_v25 = vld [vmem:[%s2012_s10 + $0x78] ss:$12 sps:$4 sm:$0xff]  }
  0x3d   : > { %1512 = vmatmul.mubr.msk.bf16.vlgmr.msra.gmra.mrb[0].mxu1 %vm475_vm1, %v432_v7  ;;  %v1710_v22 = vld [vmem:[%s2012_s10 + $0x7c] ss:$12 sps:$4 sm:$0xff]   ;;  %v1728_v24 = vld [vmem:[%s2012_s10 + $0x20] ss:$12 sps:$4 sm:$0xff]   ;;  %v1731_v26 = vld [vmem:[%s2012_s10 + $0xf8] ss:$12 sps:$4 sm:$0xff]  }
  0x3e   : > { %536 = vmatpush1.bf16.msra.mxu1 %v487_v11  ;;  %567 = vmatprep.mubr.bf16.mxu1 %v1880_v0  ;;  %v1733_v27 = vld [vmem:[%s2012_s10 + $0x38] ss:$12 sps:$4 sm:$0xff]   ;;  %v1713_v28 = vld [vmem:[%s2012_s10 + $0x94] ss:$12 sps:$4 sm:$0xff]   ;;  %v1736_v29 = vld [vmem:[%s2012_s10 + $0x110] ss:$12 sps:$4 sm:$0xff]  }
  0x3f   : > { %1116 = vmatpush1.bf16.msra.mxu0 %v1703_v15  ;;  %1597 = vmatprep.subr.bf16.mxu1 %v1721_v18  ;;  %v1715_v30 = vld [vmem:[%s2012_s10 + $0x90] ss:$12 sps:$4 sm:$0xff]   ;;  %v1716_v32 = vld [vmem:[%s2012_s10 + $0xac] ss:$12 sps:$4 sm:$0xff]   ;;  %v1741_v33 = vld [vmem:[%s2012_s10 + $0x128] ss:$12 sps:$4 sm:$0xff]   ;;  %v450_v15 = vrot.slane %v437_v62, %v2096_v6  ;;  %v454_v18 = vrot.slane %v437_v62, %v453_v9 }
  0x40   : > { %1117 = vmatprep.subr.bf16.mxu0 %v1704_v16  ;;  %v1738_v31 = vld [vmem:[%s2012_s10 + $0x50] ss:$12 sps:$4 sm:$0xff]   ;;  %v1718_v34 = vld [vmem:[%s2012_s10 + $0xa8] ss:$12 sps:$4 sm:$0xff]   ;;  %v1746_v37 = vld [vmem:[%s2012_s10 + $0x140] ss:$12 sps:$4 sm:$0xff]  }
  0x41   : > { %v1743_v35 = vld [vmem:[%s2012_s10 + $0x68] ss:$12 sps:$4 sm:$0xff]   ;;  %v1719_v36 = vld [vmem:[%s2012_s10 + $0xc4] ss:$12 sps:$4 sm:$0xff]   ;;  %v1722_v38 = vld [vmem:[%s2012_s10 + $0xc0] ss:$12 sps:$4 sm:$0xff]  }
  0x42   : > { %v1724_v39 = vld [vmem:[%s2012_s10 + $0xdc] ss:$12 sps:$4 sm:$0xff]   ;;  %v1748_v40 = vld [vmem:[%s2012_s10 + $0x80] ss:$12 sps:$4 sm:$0xff]   ;;  %v1727_v41 = vld [vmem:[%s2012_s10 + $0xd8] ss:$12 sps:$4 sm:$0xff]  }
  0x43   : > { %1118 = vmatpush1.bf16.msra.mxu0 %v1706_v17  ;;  %v1729_v42 = vld [vmem:[%s2012_s10 + $0xf4] ss:$12 sps:$4 sm:$0xff]   ;;  %v1732_v43 = vld [vmem:[%s2012_s10 + $0xf0] ss:$12 sps:$4 sm:$0xff]   ;;  %v1734_v44 = vld [vmem:[%s2012_s10 + $0x10c] ss:$12 sps:$4 sm:$0xff]  }
  0x44   : > { %1119 = vmatprep.subr.bf16.mxu0 %v1707_v19  ;;  %v1737_v45 = vld [vmem:[%s2012_s10 + $0x108] ss:$12 sps:$4 sm:$0xff]   ;;  %v1739_v46 = vld [vmem:[%s2012_s10 + $0x124] ss:$12 sps:$4 sm:$0xff]   ;;  %v1742_v47 = vld [vmem:[%s2012_s10 + $0x120] ss:$12 sps:$4 sm:$0xff]  }
  0x45   : > { %1514 = vmatmul.mubr.msk.bf16.vlgmr.msra.gmra.mrb[4].mxu1 %vm475_vm1, %v432_v7  ;;  %v1744_v48 = vld [vmem:[%s2012_s10 + $0x13c] ss:$12 sps:$4 sm:$0xff]   ;;  %v1747_v49 = vld [vmem:[%s2012_s10 + $0x138] ss:$12 sps:$4 sm:$0xff]   ;;  %v1749_v50 = vld [vmem:[%s2012_s10 + $0x154] ss:$12 sps:$4 sm:$0xff]  }
  0x46   : > { %1598 = vmatpush3.bf16.msra.mxu1 %v1723_v20  ;;  %v1751_v51 = vld [vmem:[%s2012_s10 + $0x158] ss:$12 sps:$4 sm:$0xff]   ;;  %v1752_v52 = vld [vmem:[%s2012_s10 + $0x150] ss:$12 sps:$4 sm:$0xff]   ;;  %v1757_v56 = vld [vmem:[%s2012_s10 + $0x168] ss:$12 sps:$4 sm:$0xff]  }
  0x47   : > { %1599 = vmatprep.subr.bf16.mxu1 %v1726_v23  ;;  %1120 = vmatpush1.bf16.msra.mxu0 %v1709_v21  ;;  %v1753_v53 = vld [vmem:[%s2012_s10 + $0x98] ss:$12 sps:$4 sm:$0xff]   ;;  %v1756_v55 = vld [vmem:[%s2012_s10 + $0x170] ss:$12 sps:$4 sm:$0xff]   ;;  %v1759_v21 = vld [vmem:[%s2012_s10 + $0x180] ss:$12 sps:$4 sm:$0xff]  }
  0x48   : > { %1121 = vmatprep.subr.bf16.mxu0 %v1710_v22  ;;  %v1754_v54 = vld [vmem:[%s2012_s10 + $0x16c] ss:$12 sps:$4 sm:$0xff]   ;;  %v1758_v57 = vld [vmem:[%s2012_s10 + $0xb0] ss:$12 sps:$4 sm:$0xff]   ;;  %v1762_v22 = vld [vmem:[%s2012_s10 + $0x188] ss:$12 sps:$4 sm:$0xff]  }
  0x49   : > { %v1761_v58 = vld [vmem:[%s2012_s10 + $0x184] ss:$12 sps:$4 sm:$0xff]   ;;  %v1791_v59 = vld [vmem:[%s2012_s10 + $0x240] ss:$12 sps:$4 sm:$0xff]   ;;  %v1794_v60 = vld [vmem:[%s2012_s10 + $0x248] ss:$12 sps:$4 sm:$0xff]  }
  0x4a   : > { %1600 = vmatpush3.bf16.msra.mxu1 %v1728_v24  ;;  %v1765_v24 = vld [vmem:[%s2012_s10 + $0x19c] ss:$12 sps:$4 sm:$0xff]   ;;  %s1630_s24 = smul.u32 3, %s2190_s27  ;;  %vm1309_vm3 = vcmask 359424   ;;  %s1596_s13 = sshll.u32 %s2190_s27, 4  ;;  %vm1328_vm4 = vcmask 7168  }
  0x4b   : > { %1601 = vmatprep.subr.bf16.mxu1 %v1731_v26  ;;  %1122 = vmatpush1.bf16.msra.mxu0 %v1712_v25  ;;  %s427_s17 = scalar_lea.vmem %s2179_s7, %s1596_s13 }
  0x4c   : > { %1123 = vmatprep.subr.bf16.mxu0 %v1713_v28  ;;  %s411_s18 = scalar_lea.vmem %s2176_s4, %s1630_s24  ;;  %s415_s21 = scalar_lea.vmem %s2177_s5, %s1630_s24 }
  0x4d   : > { %v1285_v9 = vld [vmem:[%s415_s21] sm:$0x7] }
  0x4e   : > { %1602 = vmatpush3.bf16.msra.mxu1 %v1733_v27 }
  0x4f   : > { %1603 = vmatprep.subr.bf16.mxu1 %v1736_v29  ;;  %1124 = vmatpush1.bf16.msra.mxu0 %v1715_v30 }
  0x50   : > { %1125 = vmatprep.subr.bf16.mxu0 %v1716_v32  ;;  %v1763_v32 = vld [vmem:[%s2012_s10 + $0x198] ss:$12 sps:$4 sm:$0xff]  }
  0x52   : > { %1604 = vmatpush3.bf16.msra.mxu1 %v1738_v31 }
  0x53   : > { %1605 = vmatprep.subr.bf16.mxu1 %v1741_v33  ;;  %1126 = vmatpush1.bf16.msra.mxu0 %v1718_v34  ;;  %v1766_v33 = vld [vmem:[%s2012_s10 + $0x1a0] ss:$12 sps:$4 sm:$0xff]  }
  0x54   : > { %1127 = vmatprep.subr.bf16.mxu0 %v1719_v36  ;;  %v1769_v36 = vld [vmem:[%s2012_s10 + $0x1b4] ss:$12 sps:$4 sm:$0xff]  }
  0x56   : > { %1606 = vmatpush3.bf16.msra.mxu1 %v1743_v35 }
  0x57   : > { %1607 = vmatprep.subr.bf16.mxu1 %v1746_v37  ;;  %1128 = vmatpush1.bf16.msra.mxu0 %v1722_v38 }
  0x58   : > { %1129 = vmatprep.subr.bf16.mxu0 %v1724_v39 }
  0x5a   : > { %1608 = vmatpush3.bf16.msra.mxu1 %v1748_v40  ;;  %v1767_v40 = vld [vmem:[%s2012_s10 + $0x1b0] ss:$12 sps:$4 sm:$0xff]  }
  0x5b   : > { %1130 = vmatpush1.bf16.msra.mxu0 %v1727_v41  ;;  %1609 = vmatprep.subr.bf16.mxu1 %v1751_v51  ;;  %v1770_v41 = vld [vmem:[%s2012_s10 + $0x1b8] ss:$12 sps:$4 sm:$0xff]   ;;  %v1782_v51 = vld [vmem:[%s2012_s10 + $0x200] ss:$12 sps:$4 sm:$0xff]  }
  0x5c   : > { %1131 = vmatprep.subr.bf16.mxu0 %v1729_v42 }
  0x5e   : > { %1610 = vmatpush3.bf16.msra.mxu1 %v1753_v53  ;;  %v1783_v53 = vld [vmem:[%s2012_s10 + $0x210] ss:$12 sps:$4 sm:$0xff]  }
  0x5f   : > { %1132 = vmatpush1.bf16.msra.mxu0 %v1732_v43  ;;  %1611 = vmatprep.subr.bf16.mxu1 %v1756_v55  ;;  %v1773_v43 = vld [vmem:[%s2012_s10 + $0x1cc] ss:$12 sps:$4 sm:$0xff]  }
  0x60   : > { %1133 = vmatprep.subr.bf16.mxu0 %v1734_v44  ;;  %v1771_v44 = vld [vmem:[%s2012_s10 + $0x1c8] ss:$12 sps:$4 sm:$0xff]   ;;  %v1789_v55 = vld [vmem:[%s2012_s10 + $0x22c] ss:$12 sps:$4 sm:$0xff]  }
  0x62   : > { %1612 = vmatpush3.bf16.msra.mxu1 %v1758_v57  ;;  %v1790_v57 = vld [vmem:[%s2012_s10 + $0x230] ss:$12 sps:$4 sm:$0xff]  }
  0x63   : > { %1134 = vmatpush1.bf16.msra.mxu0 %v1737_v45  ;;  %1238 = vmatprep.subr.bf16.mxu1 %v1880_v0  ;;  %v1774_v45 = vld [vmem:[%s2012_s10 + $0x1d0] ss:$12 sps:$4 sm:$0xff]  }
  0x64   : > { %1135 = vmatprep.subr.bf16.mxu0 %v1739_v46  ;;  %v1777_v46 = vld [vmem:[%s2012_s10 + $0x1e4] ss:$12 sps:$4 sm:$0xff]  }
  0x67   : > { %1136 = vmatpush1.bf16.msra.mxu0 %v1742_v47  ;;  %v1775_v47 = vld [vmem:[%s2012_s10 + $0x1e0] ss:$12 sps:$4 sm:$0xff]  }
  0x68   : > { %1137 = vmatprep.subr.bf16.mxu0 %v1744_v48  ;;  %v1778_v48 = vld [vmem:[%s2012_s10 + $0x1e8] ss:$12 sps:$4 sm:$0xff]  }
  0x6b   : > { %1138 = vmatpush1.bf16.msra.mxu0 %v1747_v49  ;;  %v1781_v49 = vld [vmem:[%s2012_s10 + $0x1fc] ss:$12 sps:$4 sm:$0xff]  }
  0x6c   : > { %1139 = vmatprep.subr.bf16.mxu0 %v1749_v50  ;;  %v1779_v50 = vld [vmem:[%s2012_s10 + $0x1f8] ss:$12 sps:$4 sm:$0xff]  }
  0x6f   : > { %1140 = vmatpush1.bf16.msra.mxu0 %v1752_v52  ;;  %v1785_v52 = vld [vmem:[%s2012_s10 + $0x214] ss:$12 sps:$4 sm:$0xff]  }
  0x70   : > { %1141 = vmatprep.subr.bf16.mxu0 %v1754_v54  ;;  %v1786_v54 = vld [vmem:[%s2012_s10 + $0x218] ss:$12 sps:$4 sm:$0xff]  }
  0x73   : > { %1142 = vmatpush1.bf16.msra.mxu0 %v1757_v56  ;;  %v1787_v56 = vld [vmem:[%s2012_s10 + $0x228] ss:$12 sps:$4 sm:$0xff]  }
  0x74   : > { %1154 = vmatprep.subr.bf16.mxu0 %v1761_v58  ;;  %v1793_v58 = vld [vmem:[%s2012_s10 + $0x244] ss:$12 sps:$4 sm:$0xff]  }
 0x110   : > { %v526_v3 = vpop.f32.mrb[0].mxu1 }
 0x111   : > { %v527_v4 = vadd.f32 %v526_v3, %v442_v1  ;;  %v528_v5 = vpop.f32.mrb[1].mxu1 }
 0x112   : > { %v529_v7 = vadd.f32 %v528_v5, %v446_v2  ;;  %v530_v8 = vpop.f32.mrb[2].mxu1 }
 0x113   : > { %v531_v10 = vadd.f32 %v530_v8, %v442_v1  ;;  %v532_v11 = vpop.f32.mrb[3].mxu1  ;;  %v578_v13 = vmax.f32 %v527_v4, 0.0 }
 0x114   : > { %v533_v12 = vadd.f32 %v532_v11, %v446_v2  ;;  %v579_v16 = vmax.f32 %v529_v7, 0.0  ;;  %v690_v7 = vld [vmem:[%s411_s18] sm:$0x7] }
 0x115   : > { %v582_v14 = vmax.f32 %v531_v10, 0.0  ;;  %v695_v8 = vrot.slane %v690_v7, %v2090_v61  ;;  %v699_v10 = vrot.slane %v690_v7, %v2092_v63 }
 0x116   : > { %v583_v17 = vmax.f32 %v533_v12, 0.0 }
 0x117   : > { %v586_v19 = vpack.c.bf16 %v582_v14, %v578_v13  ;;  %v1290_v13 = vrot.slane %v1285_v9, %v2090_v61 }
 0x118   : > { %v587_v20 = vpack.c.bf16 %v583_v17, %v579_v16  ;;  %v569_v23 = vpop.f32.mrb[4].mxu1 }
 0x119   : > { %v570_v25 = vadd.f32 %v569_v23, %v450_v15  ;;  %v571_v26 = vpop.f32.mrb[5].mxu1 }
 0x11a   : > { %1143 = vmatprep.mubr.bf16.mxu0 %v587_v20  ;;  %1229 = vmatprep.mubr.bf16.mxu1 %v587_v20  ;;  %v572_v27 = vadd.f32 %v571_v26, %v454_v18  ;;  %v573_v28 = vpop.f32.mrb[6].mxu1  ;;  %v1298_v20 = vrot.slane %v1285_v9, %v2096_v6 }
 0x11b   : > { %1144 = vmatmul.mubr.bf16.vlgmr.msra.gmra.mrb[0].mxu0 %v586_v19  ;;  %1230 = vmatmul.mubr.bf16.vlgmr.msra.gmra.mrb[8].mxu1 %v586_v19  ;;  %v580_v29 = vmax.f32 %v570_v25, 0.0  ;;  %v574_v30 = vadd.f32 %v573_v28, %v450_v15  ;;  %v575_v31 = vpop.f32.mrb[7].mxu1 }
 0x11c   : > { %1155 = vmatpush1.bf16.msra.mxu0 %v1759_v21  ;;  %1239 = vmatpush1.bf16.msra.mxu1 %v1762_v22  ;;  %v581_v34 = vmax.f32 %v572_v27, 0.0  ;;  %v576_v35 = vadd.f32 %v575_v31, %v454_v18  ;;  %v1294_v22 = vrot.slane %v1285_v9, %v2092_v63 }
 0x11d   : > { %1156 = vmatprep.subr.bf16.mxu0 %v1765_v24  ;;  %1240 = vmatprep.subr.bf16.mxu1 %v1880_v0  ;;  %v584_v37 = vmax.f32 %v574_v30, 0.0 }
 0x11e   : > { %v585_v38 = vmax.f32 %v576_v35, 0.0 }
 0x11f   : > { %v588_v39 = vpack.c.bf16 %v584_v37, %v580_v29 }
 0x120   : > { %1157 = vmatpush1.bf16.msra.mxu0 %v1763_v32  ;;  %1241 = vmatpush1.bf16.msra.mxu1 %v1766_v33  ;;  %v589_v42 = vpack.c.bf16 %v585_v38, %v581_v34 }
 0x121   : > { %1158 = vmatprep.subr.bf16.mxu0 %v1769_v36  ;;  %1242 = vmatprep.subr.bf16.mxu1 %v1880_v0 }
 0x122   : > { %1590 = vmatprep.mubr.msk.bf16.mxu0 %vm1107_vm2, %v589_v42  ;;  %1591 = vmatprep.mubr.msk.bf16.mxu1 %vm1107_vm2, %v589_v42 }
 0x124   : > { %1159 = vmatpush1.bf16.msra.mxu0 %v1767_v40  ;;  %1243 = vmatpush1.bf16.msra.mxu1 %v1770_v41 }
 0x125   : > { %1160 = vmatprep.subr.bf16.mxu0 %v1773_v43  ;;  %1244 = vmatprep.subr.bf16.mxu1 %v1880_v0 }
 0x128   : > { %1161 = vmatpush1.bf16.msra.mxu0 %v1771_v44  ;;  %1245 = vmatpush1.bf16.msra.mxu1 %v1774_v45  ;;  %v1592_v45 = vld [vmem:[%s418_s14] ss:$0 sm:$0xff] }
 0x129   : > { %1162 = vmatprep.subr.bf16.mxu0 %v1777_v46  ;;  %1246 = vmatprep.subr.bf16.mxu1 %v1880_v0 }
 0x12c   : > { %1163 = vmatpush1.bf16.msra.mxu0 %v1775_v47  ;;  %1247 = vmatpush1.bf16.msra.mxu1 %v1778_v48 }
 0x12d   : > { %1164 = vmatprep.subr.bf16.mxu0 %v1781_v49  ;;  %1248 = vmatprep.subr.bf16.mxu1 %v1880_v0 }
 0x130   : > { %1165 = vmatpush1.bf16.msra.mxu0 %v1779_v50  ;;  %1249 = vmatpush1.bf16.msra.mxu1 %v1782_v51 }
 0x131   : > { %1166 = vmatprep.subr.bf16.mxu0 %v1785_v52  ;;  %1250 = vmatprep.subr.bf16.mxu1 %v1880_v0 }
 0x134   : > { %1167 = vmatpush1.bf16.msra.mxu0 %v1783_v53  ;;  %1251 = vmatpush1.bf16.msra.mxu1 %v1786_v54 }
 0x135   : > { %1168 = vmatprep.subr.bf16.mxu0 %v1789_v55  ;;  %1252 = vmatprep.subr.bf16.mxu1 %v1880_v0 }
 0x138   : > { %1169 = vmatpush1.bf16.msra.mxu0 %v1787_v56  ;;  %1253 = vmatpush1.bf16.msra.mxu1 %v1790_v57 }
 0x139   : > { %1170 = vmatprep.subr.bf16.mxu0 %v1793_v58  ;;  %1254 = vmatprep.subr.bf16.mxu1 %v1880_v0  ;;  %v703_v0 = vrot.slane %v690_v7, %v2096_v6 }
 0x13c   : > { %1171 = vmatpush1.bf16.msra.mxu0 %v1791_v59  ;;  %1255 = vmatpush1.bf16.msra.mxu1 %v1794_v60 }
 0x13f   : > { %1187 = vmatmul.mubr.bf16.vlgmr.msra.gmra.mrb[0].mxu0 %v588_v39  ;;  %1271 = vmatmul.mubr.bf16.vlgmr.msra.gmra.mrb[12].mxu1 %v588_v39 }
 0x1ee   : > { %v1613_v62 = vpop.f32.mrb[8].mxu1 }
 0x1ef   : > { %v1614_v1 = vpop.f32.mrb[9].mxu1 }
 0x1f0   : > { %v1615_v2 = vadd.f32 %v1614_v1, %v1613_v62  ;;  %v1616_v3 = vpop.f32.mrb[10].mxu1 }
 0x1f1   : > { %v1617_v4 = vpop.f32.mrb[11].mxu1 }
 0x1f2   : > { %v1618_v5 = vadd.f32 %v1617_v4, %v1616_v3  ;;  %v1232_v11 = vadd.f32 %v1615_v2, %v703_v0 }
 0x1f4   : > { %v1235_v19 = vadd.f32 %v1618_v5, %v703_v0 }
 0x212   : > { %v1188_v12 = vpop.f32.mrb[0].mxu0  ;;  %v1272_v14 = vpop.f32.mrb[12].mxu1 }
 0x213   : > { %v1619_v15 = vadd.f32 %v1188_v12, %v695_v8  ;;  %v1273_v16 = vadd.f32 %v1272_v14, %v1232_v11  ;;  %v1190_v17 = vpop.f32.mrb[1].mxu0  ;;  %v1274_v18 = vpop.f32.mrb[13].mxu1 }
 0x214   : > { %v1620_v21 = vadd.f32 %v1190_v17, %v699_v10  ;;  %v1192_v23 = vpop.f32.mrb[2].mxu0  ;;  %v1275_v24 = vpop.f32.mrb[14].mxu1 }
 0x215   : > { %v1279_v25 = vmax.f32 %v1619_v15, 0.0  ;;  %v1281_v26 = vmax.f32 %v1273_v16, 0.0  ;;  %v1621_v27 = vadd.f32 %v1192_v23, %v695_v8  ;;  %v1276_v28 = vadd.f32 %v1275_v24, %v1235_v19  ;;  %v1194_v29 = vpop.f32.mrb[3].mxu0  ;;  %v1277_v30 = vpop.f32.mrb[15].mxu1 }
 0x216   : > { %v1280_v61 = vmax.f32 %v1620_v21, 0.0  ;;  %v1622_v31 = vadd.f32 %v1194_v29, %v699_v10 }
 0x217   : > { %v1302_v32 = vmul.f32 %v1290_v13, %v1279_v25  ;;  %v1282_v33 = vmax.f32 %v1621_v27, 0.0  ;;  %v1284_v34 = vmax.f32 %v1276_v28, 0.0  ;;  %v1304_v35 = vmul.f32 %v1298_v20, %v1281_v26 }
 0x218   : > { %v1303_v6 = vmul.f32 %v1294_v22, %v1280_v61  ;;  %v1283_v36 = vmax.f32 %v1622_v31, 0.0 }
 0x219   : > { %v1305_v63 = vmul.f32 %v1290_v13, %v1282_v33  ;;  %v1307_v37 = vmul.f32 %v1298_v20, %v1284_v34  ;;  %v1310_v40 = vsel %vm1309_vm3, %v1304_v35, 0.0 }
 0x21a   : > { %v1306_v38 = vmul.f32 %v1294_v22, %v1283_v36  ;;  %v1308_v39 = vadd.f32 %v1303_v6, %v1302_v32 }
 0x21b   : > { %v1315_v43 = vsel %vm1309_vm3, %v1307_v37, 0.0 }
 0x21c   : > { %v1311_v41 = vadd.f32 %v1310_v40, %v1308_v39  ;;  %v1314_v42 = vadd.f32 %v1306_v38, %v1305_v63 }
 0x21e   : > { %1312 = vadd.xlane.f32.xlu0 %v1311_v41  ;;  %v1316_v44 = vadd.f32 %v1315_v43, %v1314_v42 }
 0x222   : > { %1317 = vadd.xlane.f32.xlu0 %v1316_v44 }
 0x2ab   : > { %v1313_v46 = vpop.xlane.xlu0 %1312 }
 0x2ac   : > { %v1326_v47 = vadd.f32 %v1592_v45, %v1313_v46 }
 0x2ae   : > { %1329 = vst.msk [vmem:[%s427_s17] sm:$0xff] %vm1328_vm4, %v1326_v47 }
 0x2af   : > { %v1318_v48 = vpop.xlane.xlu0 %1317 }
 0x2b0   : > { %v1327_v49 = vadd.f32 %v1592_v45, %v1318_v48 }
 0x2b2   : > { %1330 = vst.msk [vmem:[%s427_s17 + $0x8] sm:$0xff] %vm1328_vm4, %v1327_v49 }
 0x2b3 PF: > { %s20_s29 = sadd.s32 1, %s1875_s29   ;;  %s2182_s24 = smov %s1859_s25 }
 0x2b4   : > { %p17_p7 = scmp.ge.s32.totalorder %s20_s29, 4   ;;  %s2183_s25 = smov %s1863_s26 }
 0x2b5   : > { %s2184_s26 = smov %s1966_s12  ;;  %s2185_s27 = smov %s1871_s28 }
 0x2b6   : > { %s2186_s28 = smov %s2188_s8  ;;  %19 = sbr.rel (!%p17_p7) target bundleno = 4 (0x4), region = 106 }
 0x2bd   :  { %1361 = vsyncpa [#allocation3], 1 }
 0x2be   :  { %1363 = vsyncpa [#allocation3 + $0x1], 1 }

</bundles_post_ra>
